<compile_context>
chip_gen: v5e
topology: v5e:2x2
jax: 0.10.0
libtpu: 0.0.40
codegen_flags: <defaults>
</compile_context>

<pallas_src>
from functools import partial

import jax
import jax.numpy as jnp
from jax.experimental import pallas as pl
from jax.experimental.pallas import tpu as pltpu


def _hardtanh_kernel(x_ref, o_ref, *, min_val, max_val):
    # fmax(min_val, fmin(x, max_val)) == clip; matches the CUDA kernel.
    o_ref[...] = jnp.clip(x_ref[...], min_val, max_val)


_WIDTHS = (4096, 2048, 1024, 512, 256, 128)


def _widest_divisor(n):
    for w in _WIDTHS:
        if n % w == 0:
            return w
    return None


def hardtanh(x: jax.Array, min_val: float = -1.0, max_val: float = 1.0) -> jax.Array:
    min_val = float(min_val)
    max_val = float(max_val)

    orig_shape = x.shape
    dtype = x.dtype
    n = int(x.size)
    if n == 0:
        return x

    itemsize = jnp.dtype(dtype).itemsize
    kern = partial(_hardtanh_kernel, min_val=min_val, max_val=max_val)
    flat = x.reshape(-1)

    # ---------- Small path: whole array fits comfortably in VMEM ----------
    SMALL_BYTES = 2 << 20
    if n * itemsize <= SMALL_BYTES:
        w = _widest_divisor(n)
        if w is not None:
            slab = flat.reshape(n // w, w)  # lane-dense, no copies
            out = pl.pallas_call(
                kern, out_shape=jax.ShapeDtypeStruct(slab.shape, dtype)
            )(slab)
            return out.reshape(orig_shape)
        # Ragged small case: pad to a lane multiple (cheap at <= 2 MiB) so the
        # block stays lane-dense instead of a (1, n) sublane-wasting block.
        pad = (-n) % 128
        slab = jnp.pad(flat, (0, pad)).reshape((n + pad) // 128, 128)
        out = pl.pallas_call(
            kern, out_shape=jax.ShapeDtypeStruct(slab.shape, dtype)
        )(slab)
        return out.reshape(-1)[:n].reshape(orig_shape)

    # ---------- Large path: lane-dense slab, row-tiled ----------
    width = _widest_divisor(n)
    tail = None
    if width is None:
        # Ragged: run the kernel on the lane-aligned prefix (metadata-only
        # reshape), clip the tiny (<128-element) tail directly. No full-array
        # pad / slice copies.
        aligned_n = (n // 128) * 128  # > 0 because large path implies n >> 128
        tail = jnp.clip(flat[aligned_n:], min_val, max_val)
        flat = flat[:aligned_n]
        width = _widest_divisor(aligned_n)  # at least 128
        n_proc = aligned_n
    else:
        n_proc = n

    rows = n_proc // width

    # ~4 MiB per buffer: near the HBM-roofline knee on v6e, cuts per-step
    # overhead on v7x's faster HBM, and still tiny vs. physical VMEM.
    TILE_BYTES = 4 << 20
    sub_mult = max(8, 32 // itemsize)  # f32 -> 8, bf16 -> 16, int8/fp8 -> 32
    rows_tile = max(sub_mult, (TILE_BYTES // itemsize) // width)
    rows_tile = max(sub_mult, (rows_tile // sub_mult) * sub_mult)
    # Keep at least 2 grid steps so both v7x TensorCores get work.
    if rows_tile >= rows and rows >= 2 * sub_mult:
        half = (rows + 1) // 2
        rows_tile = ((half + sub_mult - 1) // sub_mult) * sub_mult

    grid = (pl.cdiv(rows, rows_tile),)
    slab = flat.reshape(rows, width)

    out = pl.pallas_call(
        kern,
        out_shape=jax.ShapeDtypeStruct((rows, width), dtype),
        grid=grid,
        in_specs=[pl.BlockSpec((rows_tile, width), lambda i: (i, 0))],
        out_specs=pl.BlockSpec((rows_tile, width), lambda i: (i, 0)),
        compiler_params=pltpu.CompilerParams(
            dimension_semantics=("parallel",),
            # 4 live buffers * 4 MiB ~= 16 MiB; raise scoped limit so this also
            # compiles on v5e (16 MiB default) and keeps headroom on v7x.
            vmem_limit_bytes=48 << 20,
        ),
    )(slab)

    out_flat = out.reshape(-1)
    if tail is not None:
        out_flat = jnp.concatenate([out_flat, tail])
    return out_flat.reshape(orig_shape)


if __name__ == "__main__":
    key = jax.random.PRNGKey(0)

    # Small NCHW input consistent with the PyTorch module's forward.
    x = jax.random.normal(key, (2, 4, 16, 16), dtype=jnp.float32) * 3.0
    y = hardtanh(x, -1.0, 1.0)
    jax.block_until_ready(y)
    assert y.shape == x.shape and y.dtype == x.dtype
    assert jnp.array_equal(y, jnp.clip(x, -1.0, 1.0))

    # Exercise the tiled (large-input) path.
    x_big = jax.random.normal(jax.random.PRNGKey(1), (8, 64, 64, 64),
                              dtype=jnp.float32) * 3.0
    y_big = hardtanh(x_big, -1.0, 1.0)
    jax.block_until_ready(y_big)
    assert jnp.array_equal(y_big, jnp.clip(x_big, -1.0, 1.0))

    # Exercise the ragged small path (n not a multiple of 128).
    x_rag = jax.random.normal(jax.random.PRNGKey(2), (1000,),
                              dtype=jnp.float32) * 3.0
    y_rag = hardtanh(x_rag, -1.0, 1.0)
    jax.block_until_ready(y_rag)
    assert jnp.array_equal(y_rag, jnp.clip(x_rag, -1.0, 1.0))

    # Exercise the ragged large path (> 2 MiB, not a multiple of 128).
    x_rag_big = jax.random.normal(jax.random.PRNGKey(3), (524300,),
                                  dtype=jnp.float32) * 3.0
    y_rag_big = hardtanh(x_rag_big, -1.0, 1.0)
    jax.block_until_ready(y_rag_big)
    assert jnp.array_equal(y_rag_big, jnp.clip(x_rag_big, -1.0, 1.0))

    print("KERNEL_OK")
</pallas_src>

<mosaic_0001>
module attributes {stable_mosaic.version = 11 : i64} {
  func.func @_hardtanh_kernel(%arg0: memref<1x2048xf32, #tpu.memory_space<vmem>>, %arg1: memref<1x2048xf32, #tpu.memory_space<vmem>>) attributes {dimension_semantics = [], scalar_prefetch = 0 : i64, scratch_operands = 0 : i64, tpu.core_type = #tpu.core_type<tc>} {
    %c0 = arith.constant 0 : index
    %c0_0 = arith.constant 0 : index
    %0 = vector.load %arg0[%c0, %c0_0] : memref<1x2048xf32, #tpu.memory_space<vmem>>, vector<1x2048xf32>
    %cst = arith.constant -1.000000e+00 : f32
    %cst_1 = arith.constant 1.000000e+00 : f32
    %1 = vector.broadcast %cst : f32 to vector<1x2048xf32>
    %2 = arith.maximumf %1, %0 : vector<1x2048xf32>
    %3 = vector.broadcast %cst_1 : f32 to vector<1x2048xf32>
    %4 = arith.minimumf %3, %2 : vector<1x2048xf32>
    %c0_2 = arith.constant 0 : index
    %c0_3 = arith.constant 0 : index
    %5 = vector.load %arg1[%c0_2, %c0_3] : memref<1x2048xf32, #tpu.memory_space<vmem>>, vector<1x2048xf32>
    tpu.vector_store %arg1[%c0_2, %c0_3], %4 {strides = array<i32>} : memref<1x2048xf32, #tpu.memory_space<vmem>>, vector<1x2048xf32>,
    return
  }
}

</mosaic_0001>

<bundles_post_ra>
// kernel: tpu_custom_call.1
= control target key start
LH: loop header
LB: loop body
LE: loop exit
PB: predicated region body
PF: predicated region fallthrough
CT: control target
= control target key end

     0   :  { %6 = vsyncpa [#allocation3], 0  ;;  %s122_s0 = inlined_call_operand.hbm [shape: f32[1,2048], index: 0, kind: input, shape index: {}]   ;;  %s123_s1 = inlined_call_operand.hbm [shape: f32[1,2048], index: 1, kind: output, shape index: {}]  }
   0x1   :  { %7 = vsyncpa [#allocation4], 0  ;;  %s13_s8 = sshll.u32 %s122_s0, 4  ;;  %s104_s9 = smov [#allocation2]   ;;  %s14_s8 = int_to_ptr.hbm [resolvable:$true] %s13_s8 }
   0x2   :  { %s15_s10 = sshll.u32 %s104_s9, 4  ;;  %s16_s10 = int_to_ptr.vmem [resolvable:$true] %s15_s10 }
   0x3   :  { %18 = dma.hbm_to_vmem [thread:$0]  %s14_s8, 256, %s16_s10, [#allocation3]  }
   0x4   :  { %100 = dma.done.wait [#allocation3], 256  }
   0x5   :  { %101 = vsyncadd [#allocation3], 4294967040  ;;  %s105_s11 = smov [#allocation5]   ;;  %s38_s15 = sshll.u32 %s123_s1, 4  ;;  %v23_v0 = vld [vmem:[#allocation2] sm:$0xff]  ;;  %v24_v1 = vld [vmem:[#allocation2 + $0x8] sm:$0xff]  ;;  %s39_s15 = int_to_ptr.hbm [resolvable:$true] %s38_s15 }
   0x6   :  { %s36_s12 = sshll.u32 %s105_s11, 4  ;;  %v48_v2 = vclamps-f32 %v23_v0, 1.0  ;;  %v49_v3 = vclamps-f32 %v24_v1, 1.0  ;;  %s37_s12 = int_to_ptr.vmem [resolvable:$true] %s36_s12 }
   0x8   :  { %29 = vst [vmem:[#allocation5] sm:$0xff] %v48_v2 }
   0x9   :  { %30 = vst [vmem:[#allocation5 + $0x8] sm:$0xff] %v49_v3 }
   0xa   :  { %41 = dma.vmem_to_hbm [thread:$0]  %s37_s12, 256, %s39_s15, [#allocation4]  }
   0xb   :  { %102 = dma.done.wait [#allocation4], 256  }
   0xc   :  { %103 = vsyncadd [#allocation4], 4294967040 }
   0xd   :  { %46 = vsyncpa [#allocation3], 1 }
   0xe   :  { %47 = vsyncpa [#allocation4], 1 }

</bundles_post_ra>
